<compile_context>
chip_gen: v6e
topology: v6e:2x2x1
jax: 0.10.0
libtpu: 0.0.40
codegen_flags: <defaults>
</compile_context>

<pallas_src>
import jax
import jax.numpy as jnp
from jax.experimental import pallas as pl
from jax.experimental.pallas import tpu as pltpu


def _round_up(x, m):
    return ((x + m - 1) // m) * m


def _round_down(x, m):
    return (x // m) * m


def _mlp_kernel(x_ref, *rest):
    """rest = (wb_1, ..., wb_L, out_ref).

    x_ref  : (in_features, ROWS_TILE, 128) VMEM -- batch on (sublane, lane)
    wb_k   : (out_k, in_k + 1) SMEM             -- weight, bias packed as last col
    out_ref: (2, ROWS_TILE, 128) VMEM

    h_{k+1} = tanh(W_k @ h_k + b_k) after every layer (reference module has a
    Tanh after every Linear, including the last).
    """
    out_ref = rest[-1]
    wb_refs = rest[:-1]

    # Activations as a list of dense (ROWS, 128) slabs, one per feature.
    h = [x_ref[f].astype(jnp.float32) for f in range(x_ref.shape[0])]

    for wb_ref in wb_refs:
        out_k, in_k_p1 = wb_ref.shape
        in_k = in_k_p1 - 1
        new_h = []
        for j in range(out_k):
            # Tiny contraction (K <= 10): unrolled scalar*slab FMAs on the VPU;
            # weight scalars come straight from SMEM (no broadcast vregs).
            acc = h[0] * wb_ref[j, 0]
            for k in range(1, in_k):
                acc = acc + h[k] * wb_ref[j, k]
            acc = acc + wb_ref[j, in_k]            # bias (scalar)
            new_h.append(jnp.tanh(acc))            # EUP
        h = new_h

    for j in range(out_ref.shape[0]):
        out_ref[j] = h[j].astype(out_ref.dtype)


def init_mlp_params(key, input_features=2, hidden_channels=10, shift_layers=1,
                    bias=True, dtype=jnp.float32):
    """Xavier-normal weights / zero biases, PyTorch layer order.

    Each layer is packed as a single (out_features, in_features + 1) array:
    columns [:-1] are the PyTorch-layout weight (out, in), last column is the
    bias. With bias=False the bias column is zero, which is numerically
    identical to omitting it.
    """
    dims = []
    prev = input_features
    for _ in range(shift_layers - 1):
        dims.append((prev, hidden_channels))
        prev = hidden_channels
    dims.append((prev, 2))

    params = []
    for fan_in, fan_out in dims:
        key, wk = jax.random.split(key)
        std = (2.0 / (fan_in + fan_out)) ** 0.5
        w = (std * jax.random.normal(wk, (fan_out, fan_in))).astype(dtype)
        b = jnp.zeros((fan_out, 1), dtype=dtype)   # zero whether bias=True or False
        params.append(jnp.concatenate([w, b], axis=1))
    return params


def mlp_reference(x, params):
    """Plain-JAX reference (and the preferred path for tiny batches)."""
    h = x.astype(jnp.float32)
    for wb in params:
        w, b = wb[:, :-1], wb[:, -1]
        h = jnp.tanh(h @ w.T + b)
    return h.astype(x.dtype)


def mlp_forward(pupil_center, params, trial_idx=None, rows_tile_max=1024):
    """Equivalent of MLP.forward via the Pallas kernel.

    pupil_center: (batch, in_features); trial_idx optionally concatenated on
    the feature axis (plain-JAX glue, matches the PyTorch module).
    rows_tile_max: tile size in 128-wide batch rows (1024 rows = 131072 batch).
    """
    if trial_idx is not None:
        pupil_center = jnp.concatenate((pupil_center, trial_idx), axis=1)

    in_features = params[0].shape[1] - 1
    if in_features != pupil_center.shape[1]:
        raise ValueError(
            "The expected input shape of the shifter and the shape of the input "
            "do not match! (Maybe due to the appending of trial_idx to pupil_center?)")

    batch = pupil_center.shape[0]
    out_dtype = pupil_center.dtype

    # Sublane granularity depends on element packing (8 rows f32, 16 bf16, 32 int8).
    sub = {4: 8, 2: 16, 1: 32}.get(jnp.dtype(out_dtype).itemsize, 8)

    rows_needed = _round_up(max(pl.cdiv(batch, 128), 1), sub)
    rows_tile_max = max(sub, _round_down(min(int(rows_tile_max), 2048), sub))
    rows_tile = min(rows_tile_max, rows_needed)
    # v7x megacore: if there is enough work, cap the tile at ~half the rows so
    # the 1-D "parallel" grid has >=2 balanced steps for the two TensorCores.
    if rows_needed >= 16 * sub:
        half = _round_up((rows_needed + 1) // 2, sub)
        rows_tile = min(rows_tile, half)

    n_rows = _round_up(rows_needed, rows_tile)
    b_pad = n_rows * 128
    grid = (n_rows // rows_tile,)

    # One fused relayout in: pad batch -> transpose -> (features, rows, 128).
    # TODO(synk): if the producer can emit (features, rows, 128) directly (or we
    # de-interleave raw (batch, 2) blocks in-kernel), this pass disappears.
    x_3d = jnp.pad(pupil_center, ((0, b_pad - batch), (0, 0))).T.reshape(
        in_features, n_rows, 128)

    in_specs = [pl.BlockSpec((in_features, rows_tile, 128), lambda i: (0, i, 0))]
    # Packed (out, in+1) weights live in SMEM and are read as scalars.
    in_specs += [pl.BlockSpec(memory_space=pltpu.MemorySpace.SMEM) for _ in params]
    out_specs = pl.BlockSpec((2, rows_tile, 128), lambda i: (0, i, 0))

    # VMEM budget: double-buffered in/out blocks + live activation slabs,
    # clamped well under v7x's 64 MiB physical VMEM.
    blk_bytes = rows_tile * 128 * 4
    widths = [p.shape[0] for p in params]
    io_bytes = 2 * (in_features + 2) * blk_bytes
    act_bytes = (in_features + max(widths) + 4) * blk_bytes
    vmem_limit = int(min(max(io_bytes + act_bytes + (2 << 20), 16 << 20), 48 << 20))

    out_3d = pl.pallas_call(
        _mlp_kernel,
        out_shape=jax.ShapeDtypeStruct((2, n_rows, 128), out_dtype),
        grid=grid,
        in_specs=in_specs,
        out_specs=out_specs,
        compiler_params=pltpu.CompilerParams(
            dimension_semantics=("parallel",),   # shard batch-row tiles across TCs
            vmem_limit_bytes=vmem_limit,
        ),
    )(x_3d, *params)

    # One fused relayout out: (2, rows, 128) -> (2, b_pad) -> slice -> (batch, 2).
    return out_3d.reshape(2, b_pad)[:, :batch].T


if __name__ == "__main__":
    key = jax.random.PRNGKey(0)
    k_params, k_x1, k_x2, k_x3, k_t = jax.random.split(key, 5)

    # Module config: input_features=2, hidden_channels=10, shift_layers=2
    # -> Linear(2,10) + Tanh + Linear(10,2) + Tanh
    params = init_mlp_params(k_params, input_features=2, hidden_channels=10,
                             shift_layers=2, bias=True)

    # 1) Production-like tiny batch (single dense (8,128) tile).
    x_small = jax.random.normal(k_x1, (8, 2), dtype=jnp.float32)
    out_small = jax.block_until_ready(mlp_forward(x_small, params))
    ref_small = mlp_reference(x_small, params)
    assert out_small.shape == (8, 2)
    assert jnp.allclose(out_small, ref_small, atol=1e-5, rtol=1e-5)

    # 2) Multi-tile grid + lane/sublane padding slice (tile forced small).
    x_big = jax.random.normal(k_x2, (2100, 2), dtype=jnp.float32)
    out_big = jax.block_until_ready(mlp_forward(x_big, params, rows_tile_max=8))
    ref_big = mlp_reference(x_big, params)
    assert out_big.shape == (2100, 2)
    assert jnp.allclose(out_big, ref_big, atol=1e-5, rtol=1e-5)

    # 3) trial_idx concatenation path (plain-JAX glue, as in the module).
    pupil = jax.random.normal(k_x3, (8, 1), dtype=jnp.float32)
    trial = jax.random.normal(k_t, (8, 1), dtype=jnp.float32)
    out_tr = jax.block_until_ready(mlp_forward(pupil, params, trial_idx=trial))
    ref_tr = mlp_reference(jnp.concatenate((pupil, trial), axis=1), params)
    assert out_tr.shape == (8, 2)
    assert jnp.allclose(out_tr, ref_tr, atol=1e-5, rtol=1e-5)

    print("KERNEL_OK")
</pallas_src>

<mosaic_0001>
module attributes {stable_mosaic.version = 11 : i64} {
  func.func @_mlp_kernel(%arg0: i32, %arg1: memref<2x8x128xf32, #tpu.memory_space<vmem>>, %arg2: memref<10x3xf32, #tpu.memory_space<smem>>, %arg3: memref<2x11xf32, #tpu.memory_space<smem>>, %arg4: memref<2x8x128xf32, #tpu.memory_space<vmem>>) attributes {dimension_semantics = [#tpu.dimension_semantics<parallel>], iteration_bounds = array<i64: 1>, scalar_prefetch = 0 : i64, scratch_operands = 0 : i64, tpu.core_type = #tpu.core_type<tc>, window_params = [{transform_indices = @transform_0, window_bounds = array<i64: 2, 8, 128>}, {transform_indices = @transform_1, window_bounds = array<i64: 10, 3>}, {transform_indices = @transform_2, window_bounds = array<i64: 2, 11>}, {transform_indices = @transform_3, window_bounds = array<i64: 2, 8, 128>}]} {
    %c0 = arith.constant 0 : index
    %c0_0 = arith.constant 0 : index
    %c0_1 = arith.constant 0 : index
    %0 = vector.load %arg1[%c0, %c0_0, %c0_1] : memref<2x8x128xf32, #tpu.memory_space<vmem>>, vector<1x8x128xf32>
    %1 = vector.shape_cast %0 : vector<1x8x128xf32> to vector<8x128xf32>
    %c1 = arith.constant 1 : index
    %c0_2 = arith.constant 0 : index
    %c0_3 = arith.constant 0 : index
    %2 = vector.load %arg1[%c1, %c0_2, %c0_3] : memref<2x8x128xf32, #tpu.memory_space<vmem>>, vector<1x8x128xf32>
    %3 = vector.shape_cast %2 : vector<1x8x128xf32> to vector<8x128xf32>
    %c0_4 = arith.constant 0 : index
    %c0_5 = arith.constant 0 : index
    %4 = memref.load %arg2[%c0_4, %c0_5] : memref<10x3xf32, #tpu.memory_space<smem>>
    %5 = vector.broadcast %4 : f32 to vector<8x128xf32>
    %6 = arith.mulf %1, %5 : vector<8x128xf32>
    %c0_6 = arith.constant 0 : index
    %c1_7 = arith.constant 1 : index
    %7 = memref.load %arg2[%c0_6, %c1_7] : memref<10x3xf32, #tpu.memory_space<smem>>
    %8 = vector.broadcast %7 : f32 to vector<8x128xf32>
    %9 = arith.mulf %3, %8 : vector<8x128xf32>
    %10 = arith.addf %6, %9 : vector<8x128xf32>
    %c0_8 = arith.constant 0 : index
    %c2 = arith.constant 2 : index
    %11 = memref.load %arg2[%c0_8, %c2] : memref<10x3xf32, #tpu.memory_space<smem>>
    %12 = vector.broadcast %11 : f32 to vector<8x128xf32>
    %13 = arith.addf %10, %12 : vector<8x128xf32>
    %14 = math.tanh %13 : vector<8x128xf32>
    %c1_9 = arith.constant 1 : index
    %c0_10 = arith.constant 0 : index
    %15 = memref.load %arg2[%c1_9, %c0_10] : memref<10x3xf32, #tpu.memory_space<smem>>
    %16 = vector.broadcast %15 : f32 to vector<8x128xf32>
    %17 = arith.mulf %1, %16 : vector<8x128xf32>
    %c1_11 = arith.constant 1 : index
    %c1_12 = arith.constant 1 : index
    %18 = memref.load %arg2[%c1_11, %c1_12] : memref<10x3xf32, #tpu.memory_space<smem>>
    %19 = vector.broadcast %18 : f32 to vector<8x128xf32>
    %20 = arith.mulf %3, %19 : vector<8x128xf32>
    %21 = arith.addf %17, %20 : vector<8x128xf32>
    %c1_13 = arith.constant 1 : index
    %c2_14 = arith.constant 2 : index
    %22 = memref.load %arg2[%c1_13, %c2_14] : memref<10x3xf32, #tpu.memory_space<smem>>
    %23 = vector.broadcast %22 : f32 to vector<8x128xf32>
    %24 = arith.addf %21, %23 : vector<8x128xf32>
    %25 = math.tanh %24 : vector<8x128xf32>
    %c2_15 = arith.constant 2 : index
    %c0_16 = arith.constant 0 : index
    %26 = memref.load %arg2[%c2_15, %c0_16] : memref<10x3xf32, #tpu.memory_space<smem>>
    %27 = vector.broadcast %26 : f32 to vector<8x128xf32>
    %28 = arith.mulf %1, %27 : vector<8x128xf32>
    %c2_17 = arith.constant 2 : index
    %c1_18 = arith.constant 1 : index
    %29 = memref.load %arg2[%c2_17, %c1_18] : memref<10x3xf32, #tpu.memory_space<smem>>
    %30 = vector.broadcast %29 : f32 to vector<8x128xf32>
    %31 = arith.mulf %3, %30 : vector<8x128xf32>
    %32 = arith.addf %28, %31 : vector<8x128xf32>
    %c2_19 = arith.constant 2 : index
    %c2_20 = arith.constant 2 : index
    %33 = memref.load %arg2[%c2_19, %c2_20] : memref<10x3xf32, #tpu.memory_space<smem>>
    %34 = vector.broadcast %33 : f32 to vector<8x128xf32>
    %35 = arith.addf %32, %34 : vector<8x128xf32>
    %36 = math.tanh %35 : vector<8x128xf32>
    %c3 = arith.constant 3 : index
    %c0_21 = arith.constant 0 : index
    %37 = memref.load %arg2[%c3, %c0_21] : memref<10x3xf32, #tpu.memory_space<smem>>
    %38 = vector.broadcast %37 : f32 to vector<8x128xf32>
    %39 = arith.mulf %1, %38 : vector<8x128xf32>
    %c3_22 = arith.constant 3 : index
    %c1_23 = arith.constant 1 : index
    %40 = memref.load %arg2[%c3_22, %c1_23] : memref<10x3xf32, #tpu.memory_space<smem>>
    %41 = vector.broadcast %40 : f32 to vector<8x128xf32>
    %42 = arith.mulf %3, %41 : vector<8x128xf32>
    %43 = arith.addf %39, %42 : vector<8x128xf32>
    %c3_24 = arith.constant 3 : index
    %c2_25 = arith.constant 2 : index
    %44 = memref.load %arg2[%c3_24, %c2_25] : memref<10x3xf32, #tpu.memory_space<smem>>
    %45 = vector.broadcast %44 : f32 to vector<8x128xf32>
    %46 = arith.addf %43, %45 : vector<8x128xf32>
    %47 = math.tanh %46 : vector<8x128xf32>
    %c4 = arith.constant 4 : index
    %c0_26 = arith.constant 0 : index
    %48 = memref.load %arg2[%c4, %c0_26] : memref<10x3xf32, #tpu.memory_space<smem>>
    %49 = vector.broadcast %48 : f32 to vector<8x128xf32>
    %50 = arith.mulf %1, %49 : vector<8x128xf32>
    %c4_27 = arith.constant 4 : index
    %c1_28 = arith.constant 1 : index
    %51 = memref.load %arg2[%c4_27, %c1_28] : memref<10x3xf32, #tpu.memory_space<smem>>
    %52 = vector.broadcast %51 : f32 to vector<8x128xf32>
    %53 = arith.mulf %3, %52 : vector<8x128xf32>
    %54 = arith.addf %50, %53 : vector<8x128xf32>
    %c4_29 = arith.constant 4 : index
    %c2_30 = arith.constant 2 : index
    %55 = memref.load %arg2[%c4_29, %c2_30] : memref<10x3xf32, #tpu.memory_space<smem>>
    %56 = vector.broadcast %55 : f32 to vector<8x128xf32>
    %57 = arith.addf %54, %56 : vector<8x128xf32>
    %58 = math.tanh %57 : vector<8x128xf32>
    %c5 = arith.constant 5 : index
    %c0_31 = arith.constant 0 : index
    %59 = memref.load %arg2[%c5, %c0_31] : memref<10x3xf32, #tpu.memory_space<smem>>
    %60 = vector.broadcast %59 : f32 to vector<8x128xf32>
    %61 = arith.mulf %1, %60 : vector<8x128xf32>
    %c5_32 = arith.constant 5 : index
    %c1_33 = arith.constant 1 : index
    %62 = memref.load %arg2[%c5_32, %c1_33] : memref<10x3xf32, #tpu.memory_space<smem>>
    %63 = vector.broadcast %62 : f32 to vector<8x128xf32>
    %64 = arith.mulf %3, %63 : vector<8x128xf32>
    %65 = arith.addf %61, %64 : vector<8x128xf32>
    %c5_34 = arith.constant 5 : index
    %c2_35 = arith.constant 2 : index
    %66 = memref.load %arg2[%c5_34, %c2_35] : memref<10x3xf32, #tpu.memory_space<smem>>
    %67 = vector.broadcast %66 : f32 to vector<8x128xf32>
    %68 = arith.addf %65, %67 : vector<8x128xf32>
    %69 = math.tanh %68 : vector<8x128xf32>
    %c6 = arith.constant 6 : index
    %c0_36 = arith.constant 0 : index
    %70 = memref.load %arg2[%c6, %c0_36] : memref<10x3xf32, #tpu.memory_space<smem>>
    %71 = vector.broadcast %70 : f32 to vector<8x128xf32>
    %72 = arith.mulf %1, %71 : vector<8x128xf32>
    %c6_37 = arith.constant 6 : index
    %c1_38 = arith.constant 1 : index
    %73 = memref.load %arg2[%c6_37, %c1_38] : memref<10x3xf32, #tpu.memory_space<smem>>
    %74 = vector.broadcast %73 : f32 to vector<8x128xf32>
    %75 = arith.mulf %3, %74 : vector<8x128xf32>
    %76 = arith.addf %72, %75 : vector<8x128xf32>
    %c6_39 = arith.constant 6 : index
    %c2_40 = arith.constant 2 : index
    %77 = memref.load %arg2[%c6_39, %c2_40] : memref<10x3xf32, #tpu.memory_space<smem>>
    %78 = vector.broadcast %77 : f32 to vector<8x128xf32>
    %79 = arith.addf %76, %78 : vector<8x128xf32>
    %80 = math.tanh %79 : vector<8x128xf32>
    %c7 = arith.constant 7 : index
    %c0_41 = arith.constant 0 : index
    %81 = memref.load %arg2[%c7, %c0_41] : memref<10x3xf32, #tpu.memory_space<smem>>
    %82 = vector.broadcast %81 : f32 to vector<8x128xf32>
    %83 = arith.mulf %1, %82 : vector<8x128xf32>
    %c7_42 = arith.constant 7 : index
    %c1_43 = arith.constant 1 : index
    %84 = memref.load %arg2[%c7_42, %c1_43] : memref<10x3xf32, #tpu.memory_space<smem>>
    %85 = vector.broadcast %84 : f32 to vector<8x128xf32>
    %86 = arith.mulf %3, %85 : vector<8x128xf32>
    %87 = arith.addf %83, %86 : vector<8x128xf32>
    %c7_44 = arith.constant 7 : index
    %c2_45 = arith.constant 2 : index
    %88 = memref.load %arg2[%c7_44, %c2_45] : memref<10x3xf32, #tpu.memory_space<smem>>
    %89 = vector.broadcast %88 : f32 to vector<8x128xf32>
    %90 = arith.addf %87, %89 : vector<8x128xf32>
    %91 = math.tanh %90 : vector<8x128xf32>
    %c8 = arith.constant 8 : index
    %c0_46 = arith.constant 0 : index
    %92 = memref.load %arg2[%c8, %c0_46] : memref<10x3xf32, #tpu.memory_space<smem>>
    %93 = vector.broadcast %92 : f32 to vector<8x128xf32>
    %94 = arith.mulf %1, %93 : vector<8x128xf32>
    %c8_47 = arith.constant 8 : index
    %c1_48 = arith.constant 1 : index
    %95 = memref.load %arg2[%c8_47, %c1_48] : memref<10x3xf32, #tpu.memory_space<smem>>
    %96 = vector.broadcast %95 : f32 to vector<8x128xf32>
    %97 = arith.mulf %3, %96 : vector<8x128xf32>
    %98 = arith.addf %94, %97 : vector<8x128xf32>
    %c8_49 = arith.constant 8 : index
    %c2_50 = arith.constant 2 : index
    %99 = memref.load %arg2[%c8_49, %c2_50] : memref<10x3xf32, #tpu.memory_space<smem>>
    %100 = vector.broadcast %99 : f32 to vector<8x128xf32>
    %101 = arith.addf %98, %100 : vector<8x128xf32>
    %102 = math.tanh %101 : vector<8x128xf32>
    %c9 = arith.constant 9 : index
    %c0_51 = arith.constant 0 : index
    %103 = memref.load %arg2[%c9, %c0_51] : memref<10x3xf32, #tpu.memory_space<smem>>
    %104 = vector.broadcast %103 : f32 to vector<8x128xf32>
    %105 = arith.mulf %1, %104 : vector<8x128xf32>
    %c9_52 = arith.constant 9 : index
    %c1_53 = arith.constant 1 : index
    %106 = memref.load %arg2[%c9_52, %c1_53] : memref<10x3xf32, #tpu.memory_space<smem>>
    %107 = vector.broadcast %106 : f32 to vector<8x128xf32>
    %108 = arith.mulf %3, %107 : vector<8x128xf32>
    %109 = arith.addf %105, %108 : vector<8x128xf32>
    %c9_54 = arith.constant 9 : index
    %c2_55 = arith.constant 2 : index
    %110 = memref.load %arg2[%c9_54, %c2_55] : memref<10x3xf32, #tpu.memory_space<smem>>
    %111 = vector.broadcast %110 : f32 to vector<8x128xf32>
    %112 = arith.addf %109, %111 : vector<8x128xf32>
    %113 = math.tanh %112 : vector<8x128xf32>
    %c0_56 = arith.constant 0 : index
    %c0_57 = arith.constant 0 : index
    %114 = memref.load %arg3[%c0_56, %c0_57] : memref<2x11xf32, #tpu.memory_space<smem>>
    %115 = vector.broadcast %114 : f32 to vector<8x128xf32>
    %116 = arith.mulf %14, %115 : vector<8x128xf32>
    %c0_58 = arith.constant 0 : index
    %c1_59 = arith.constant 1 : index
    %117 = memref.load %arg3[%c0_58, %c1_59] : memref<2x11xf32, #tpu.memory_space<smem>>
    %118 = vector.broadcast %117 : f32 to vector<8x128xf32>
    %119 = arith.mulf %25, %118 : vector<8x128xf32>
    %120 = arith.addf %116, %119 : vector<8x128xf32>
    %c0_60 = arith.constant 0 : index
    %c2_61 = arith.constant 2 : index
    %121 = memref.load %arg3[%c0_60, %c2_61] : memref<2x11xf32, #tpu.memory_space<smem>>
    %122 = vector.broadcast %121 : f32 to vector<8x128xf32>
    %123 = arith.mulf %36, %122 : vector<8x128xf32>
    %124 = arith.addf %120, %123 : vector<8x128xf32>
    %c0_62 = arith.constant 0 : index
    %c3_63 = arith.constant 3 : index
    %125 = memref.load %arg3[%c0_62, %c3_63] : memref<2x11xf32, #tpu.memory_space<smem>>
    %126 = vector.broadcast %125 : f32 to vector<8x128xf32>
    %127 = arith.mulf %47, %126 : vector<8x128xf32>
    %128 = arith.addf %124, %127 : vector<8x128xf32>
    %c0_64 = arith.constant 0 : index
    %c4_65 = arith.constant 4 : index
    %129 = memref.load %arg3[%c0_64, %c4_65] : memref<2x11xf32, #tpu.memory_space<smem>>
    %130 = vector.broadcast %129 : f32 to vector<8x128xf32>
    %131 = arith.mulf %58, %130 : vector<8x128xf32>
    %132 = arith.addf %128, %131 : vector<8x128xf32>
    %c0_66 = arith.constant 0 : index
    %c5_67 = arith.constant 5 : index
    %133 = memref.load %arg3[%c0_66, %c5_67] : memref<2x11xf32, #tpu.memory_space<smem>>
    %134 = vector.broadcast %133 : f32 to vector<8x128xf32>
    %135 = arith.mulf %69, %134 : vector<8x128xf32>
    %136 = arith.addf %132, %135 : vector<8x128xf32>
    %c0_68 = arith.constant 0 : index
    %c6_69 = arith.constant 6 : index
    %137 = memref.load %arg3[%c0_68, %c6_69] : memref<2x11xf32, #tpu.memory_space<smem>>
    %138 = vector.broadcast %137 : f32 to vector<8x128xf32>
    %139 = arith.mulf %80, %138 : vector<8x128xf32>
    %140 = arith.addf %136, %139 : vector<8x128xf32>
    %c0_70 = arith.constant 0 : index
    %c7_71 = arith.constant 7 : index
    %141 = memref.load %arg3[%c0_70, %c7_71] : memref<2x11xf32, #tpu.memory_space<smem>>
    %142 = vector.broadcast %141 : f32 to vector<8x128xf32>
    %143 = arith.mulf %91, %142 : vector<8x128xf32>
    %144 = arith.addf %140, %143 : vector<8x128xf32>
    %c0_72 = arith.constant 0 : index
    %c8_73 = arith.constant 8 : index
    %145 = memref.load %arg3[%c0_72, %c8_73] : memref<2x11xf32, #tpu.memory_space<smem>>
    %146 = vector.broadcast %145 : f32 to vector<8x128xf32>
    %147 = arith.mulf %102, %146 : vector<8x128xf32>
    %148 = arith.addf %144, %147 : vector<8x128xf32>
    %c0_74 = arith.constant 0 : index
    %c9_75 = arith.constant 9 : index
    %149 = memref.load %arg3[%c0_74, %c9_75] : memref<2x11xf32, #tpu.memory_space<smem>>
    %150 = vector.broadcast %149 : f32 to vector<8x128xf32>
    %151 = arith.mulf %113, %150 : vector<8x128xf32>
    %152 = arith.addf %148, %151 : vector<8x128xf32>
    %c0_76 = arith.constant 0 : index
    %c10 = arith.constant 10 : index
    %153 = memref.load %arg3[%c0_76, %c10] : memref<2x11xf32, #tpu.memory_space<smem>>
    %154 = vector.broadcast %153 : f32 to vector<8x128xf32>
    %155 = arith.addf %152, %154 : vector<8x128xf32>
    %156 = math.tanh %155 : vector<8x128xf32>
    %c1_77 = arith.constant 1 : index
    %c0_78 = arith.constant 0 : index
    %157 = memref.load %arg3[%c1_77, %c0_78] : memref<2x11xf32, #tpu.memory_space<smem>>
    %158 = vector.broadcast %157 : f32 to vector<8x128xf32>
    %159 = arith.mulf %14, %158 : vector<8x128xf32>
    %c1_79 = arith.constant 1 : index
    %c1_80 = arith.constant 1 : index
    %160 = memref.load %arg3[%c1_79, %c1_80] : memref<2x11xf32, #tpu.memory_space<smem>>
    %161 = vector.broadcast %160 : f32 to vector<8x128xf32>
    %162 = arith.mulf %25, %161 : vector<8x128xf32>
    %163 = arith.addf %159, %162 : vector<8x128xf32>
    %c1_81 = arith.constant 1 : index
    %c2_82 = arith.constant 2 : index
    %164 = memref.load %arg3[%c1_81, %c2_82] : memref<2x11xf32, #tpu.memory_space<smem>>
    %165 = vector.broadcast %164 : f32 to vector<8x128xf32>
    %166 = arith.mulf %36, %165 : vector<8x128xf32>
    %167 = arith.addf %163, %166 : vector<8x128xf32>
    %c1_83 = arith.constant 1 : index
    %c3_84 = arith.constant 3 : index
    %168 = memref.load %arg3[%c1_83, %c3_84] : memref<2x11xf32, #tpu.memory_space<smem>>
    %169 = vector.broadcast %168 : f32 to vector<8x128xf32>
    %170 = arith.mulf %47, %169 : vector<8x128xf32>
    %171 = arith.addf %167, %170 : vector<8x128xf32>
    %c1_85 = arith.constant 1 : index
    %c4_86 = arith.constant 4 : index
    %172 = memref.load %arg3[%c1_85, %c4_86] : memref<2x11xf32, #tpu.memory_space<smem>>
    %173 = vector.broadcast %172 : f32 to vector<8x128xf32>
    %174 = arith.mulf %58, %173 : vector<8x128xf32>
    %175 = arith.addf %171, %174 : vector<8x128xf32>
    %c1_87 = arith.constant 1 : index
    %c5_88 = arith.constant 5 : index
    %176 = memref.load %arg3[%c1_87, %c5_88] : memref<2x11xf32, #tpu.memory_space<smem>>
    %177 = vector.broadcast %176 : f32 to vector<8x128xf32>
    %178 = arith.mulf %69, %177 : vector<8x128xf32>
    %179 = arith.addf %175, %178 : vector<8x128xf32>
    %c1_89 = arith.constant 1 : index
    %c6_90 = arith.constant 6 : index
    %180 = memref.load %arg3[%c1_89, %c6_90] : memref<2x11xf32, #tpu.memory_space<smem>>
    %181 = vector.broadcast %180 : f32 to vector<8x128xf32>
    %182 = arith.mulf %80, %181 : vector<8x128xf32>
    %183 = arith.addf %179, %182 : vector<8x128xf32>
    %c1_91 = arith.constant 1 : index
    %c7_92 = arith.constant 7 : index
    %184 = memref.load %arg3[%c1_91, %c7_92] : memref<2x11xf32, #tpu.memory_space<smem>>
    %185 = vector.broadcast %184 : f32 to vector<8x128xf32>
    %186 = arith.mulf %91, %185 : vector<8x128xf32>
    %187 = arith.addf %183, %186 : vector<8x128xf32>
    %c1_93 = arith.constant 1 : index
    %c8_94 = arith.constant 8 : index
    %188 = memref.load %arg3[%c1_93, %c8_94] : memref<2x11xf32, #tpu.memory_space<smem>>
    %189 = vector.broadcast %188 : f32 to vector<8x128xf32>
    %190 = arith.mulf %102, %189 : vector<8x128xf32>
    %191 = arith.addf %187, %190 : vector<8x128xf32>
    %c1_95 = arith.constant 1 : index
    %c9_96 = arith.constant 9 : index
    %192 = memref.load %arg3[%c1_95, %c9_96] : memref<2x11xf32, #tpu.memory_space<smem>>
    %193 = vector.broadcast %192 : f32 to vector<8x128xf32>
    %194 = arith.mulf %113, %193 : vector<8x128xf32>
    %195 = arith.addf %191, %194 : vector<8x128xf32>
    %c1_97 = arith.constant 1 : index
    %c10_98 = arith.constant 10 : index
    %196 = memref.load %arg3[%c1_97, %c10_98] : memref<2x11xf32, #tpu.memory_space<smem>>
    %197 = vector.broadcast %196 : f32 to vector<8x128xf32>
    %198 = arith.addf %195, %197 : vector<8x128xf32>
    %199 = math.tanh %198 : vector<8x128xf32>
    %c0_99 = arith.constant 0 : index
    %c0_100 = arith.constant 0 : index
    %c0_101 = arith.constant 0 : index
    %200 = vector.load %arg4[%c0_99, %c0_100, %c0_101] : memref<2x8x128xf32, #tpu.memory_space<vmem>>, vector<1x8x128xf32>
    %201 = vector.shape_cast %200 : vector<1x8x128xf32> to vector<8x128xf32>
    %202 = vector.shape_cast %156 : vector<8x128xf32> to vector<1x8x128xf32>
    tpu.vector_store %arg4[%c0_99, %c0_100, %c0_101], %202 {strides = array<i32>} : memref<2x8x128xf32, #tpu.memory_space<vmem>>, vector<1x8x128xf32>,
    %c1_102 = arith.constant 1 : index
    %c0_103 = arith.constant 0 : index
    %c0_104 = arith.constant 0 : index
    %203 = vector.load %arg4[%c1_102, %c0_103, %c0_104] : memref<2x8x128xf32, #tpu.memory_space<vmem>>, vector<1x8x128xf32>
    %204 = vector.shape_cast %203 : vector<1x8x128xf32> to vector<8x128xf32>
    %205 = vector.shape_cast %199 : vector<8x128xf32> to vector<1x8x128xf32>
    tpu.vector_store %arg4[%c1_102, %c0_103, %c0_104], %205 {strides = array<i32>} : memref<2x8x128xf32, #tpu.memory_space<vmem>>, vector<1x8x128xf32>,
    return
  }
  func.func @transform_0(%arg0: i32) -> (i32, i32, i32) {
    %c0_i32 = arith.constant 0 : i32
    %c0_i32_0 = arith.constant 0 : i32
    %c0_i32_1 = arith.constant 0 : i32
    return %c0_i32, %arg0, %c0_i32_0 : i32, i32, i32
  }
  func.func @transform_1(%arg0: i32) -> (i32, i32) {
    %c0_i32 = arith.constant 0 : i32
    %c0_i32_0 = arith.constant 0 : i32
    %c0_i32_1 = arith.constant 0 : i32
    return %c0_i32, %c0_i32_0 : i32, i32
  }
  func.func @transform_2(%arg0: i32) -> (i32, i32) {
    %c0_i32 = arith.constant 0 : i32
    %c0_i32_0 = arith.constant 0 : i32
    %c0_i32_1 = arith.constant 0 : i32
    return %c0_i32, %c0_i32_0 : i32, i32
  }
  func.func @transform_3(%arg0: i32) -> (i32, i32, i32) {
    %c0_i32 = arith.constant 0 : i32
    %c0_i32_0 = arith.constant 0 : i32
    %c0_i32_1 = arith.constant 0 : i32
    return %c0_i32, %arg0, %c0_i32_0 : i32, i32, i32
  }
}

</mosaic_0001>

<bundles_post_ra>
// kernel: tpu_custom_call.1
= control target key start
LH: loop header
LB: loop body
LE: loop exit
PB: predicated region body
PF: predicated region fallthrough
CT: control target
= control target key end

     0   :  { %8 = vsyncpa [#allocation4], 0  ;;  %s525_s0 = inlined_call_operand.vmem [shape: f32[2,8,128], index: 0, kind: input, shape index: {}]   ;;  %s526_s1 = inlined_call_operand.vmem [shape: f32[10,3], index: 1, kind: input, shape index: {}]   ;;  %s527_s2 = inlined_call_operand.vmem [shape: f32[2,11], index: 2, kind: input, shape index: {}]   ;;  %s528_s3 = inlined_call_operand.hbm [shape: f32[2,8,128], index: 3, kind: output, shape index: {}]  }
   0x1   :  { %9 = vsyncpa [#allocation6], 0 }
   0x2   :  { %10 = vsyncpa [#allocation3], 0  ;;  %s18_s14 = sshll.u32 %s526_s1, 4  ;;  %s31_s17 = sshll.u32 %s527_s2, 4  ;;  %s19_s14 = int_to_ptr.vmem [resolvable:$true] %s18_s14  ;;  %s32_s17 = int_to_ptr.vmem [resolvable:$true] %s31_s17 }
   0x3   :  { %s342_s18 = scalar_lea.vmem %s19_s14, 256  ;;  %p347_p1 = scmp.lt.s32.totalorder %s19_s14, %s19_s14 }
   0x4   :  { %p343_p0 = scmp.ne.s32.totalorder %s19_s14, %s342_s18  ;;  %p348_p2 = scmp.lt.s32.totalorder %s342_s18, %s342_s18 }
   0x6   :  { %p349_p3 = por %p348_p2, %p347_p1 }
   0x8   :  { %p350_p4 = pnand %p349_p3, %p343_p0 }
   0xa   :  { %353 = shalt.err (!%p350_p4)
}
   0xb   :  { %s392_s19 = smov [#allocation2]   ;;  %s393_s20 = smov 128  }
   0xc   :  { %s394_s21 = smov 8   ;;  %s354_s1 = scalar_lea.vmem %s32_s17, 32 }
   0xd   :  { %24 = dma.vmem_to_smem %s19_s14, 256, %s392_s19, [#allocation4], %s393_s20, %s393_s20, %s394_s21  }
   0xe   :  { %p355_p5 = scmp.ne.s32.totalorder %s32_s17, %s354_s1  ;;  %p359_p6 = scmp.lt.s32.totalorder %s32_s17, %s32_s17 }
   0xf   :  { %p360_p7 = scmp.lt.s32.totalorder %s354_s1, %s354_s1 }
  0x11   :  { %p361_p8 = por %p360_p7, %p359_p6 }
  0x13   :  { %p362_p9 = pnand %p361_p8, %p355_p5 }
  0x15   :  { %365 = shalt.err (!%p362_p9)
}
  0x16   :  { %s395_s2 = smov [#allocation5]  }
  0x17   :  { %34 = dma.vmem_to_smem %s32_s17, 32, %s395_s2, [#allocation6]  }
  0x18   :  { %386 = dma.done.wait [#allocation4], 256  }
  0x19   :  { %387 = vsyncadd [#allocation4], 4294967040 }
  0x1a   :  { %388 = dma.done.wait [#allocation6], 32  }
  0x1b   :  { %389 = vsyncadd [#allocation6], 4294967264 }
  0x1c   :  { %41 = sfence }
  0x1d   :  { %s45_s22 = sld [smem:[#allocation2]]  ;;  %v433_v0 = vld [vmem:[%s525_s0] sm:$0xff]  ;;  %v438_v1 = vld [vmem:[%s525_s0 + $0x8] sm:$0xff] }
  0x1e   :  { %s263_s23 = sld [smem:[#allocation2 + $0x1]] }
  0x1f   :  { %s426_s24 = sld [smem:[#allocation2 + $0x2]] }
  0x20   :  { %s265_s25 = sld [smem:[#allocation2 + $0x80]] }
  0x21   :  { %s266_s26 = sld [smem:[#allocation2 + $0x81]] }
  0x22   :  { %s428_s27 = sld [smem:[#allocation2 + $0x82]] }
  0x23   :  { %v46_v2 = vstv %s45_s22  ;;  %s268_s5 = sld [smem:[#allocation2 + $0x100]] }
  0x24   :  { %v49_v3 = vstv %s263_s23  ;;  %s269_s6 = sld [smem:[#allocation2 + $0x101]]  ;;  %v47_v4 = vmul.f32 %v46_v2, %v433_v0 }
  0x25   :  { %s440_s7 = sld [smem:[#allocation2 + $0x102]]  ;;  %v50_v5 = vmul.f32 %v438_v1, %v49_v3  ;;  %v53_v14 = vstv %s426_s24 }
  0x26   :  { %v57_v6 = vstv %s265_s25  ;;  %s271_s8 = sld [smem:[#allocation2 + $0x180]] }
  0x27   :  { %v58_v7 = vmul.f32 %v57_v6, %v433_v0  ;;  %v60_v8 = vstv %s266_s26  ;;  %s272_s9 = sld [smem:[#allocation2 + $0x181]]  ;;  %v51_v11 = vadd.f32 %v50_v5, %v47_v4 }
  0x28   :  { %v61_v9 = vmul.f32 %v438_v1, %v60_v8  ;;  %s446_s0 = sld [smem:[#allocation2 + $0x182]]  ;;  %v64_v17 = vstv %s428_s27 }
  0x29   :  { %v68_v10 = vstv %s268_s5  ;;  %s274_s10 = sld [smem:[#allocation2 + $0x200]]  ;;  %v54_v23 = vadd.f32 %v53_v14, %v51_v11 }
  0x2a   :  { %v69_v12 = vmul.f32 %v68_v10, %v433_v0  ;;  %v71_v13 = vstv %s269_s6  ;;  %s275_s11 = sld [smem:[#allocation2 + $0x201]]  ;;  %v62_v15 = vadd.f32 %v61_v9, %v58_v7 }
  0x2b   :  { %v72_v16 = vmul.f32 %v438_v1, %v71_v13  ;;  %s451_s12 = sld [smem:[#allocation2 + $0x202]]  ;;  %v75_v20 = vstv %s440_s7  ;;  %318 = vtanh.f32 %v54_v23 }
  0x2c   :  { %v79_v18 = vstv %s271_s8  ;;  %s277_s13 = sld [smem:[#allocation2 + $0x280]]  ;;  %v65_v25 = vadd.f32 %v64_v17, %v62_v15 }
  0x2d   :  { %v73_v19 = vadd.f32 %v72_v16, %v69_v12  ;;  %v80_v21 = vmul.f32 %v79_v18, %v433_v0  ;;  %v82_v22 = vstv %s272_s9  ;;  %s278_s14 = sld [smem:[#allocation2 + $0x281]] }
  0x2e   :  { %v83_v24 = vmul.f32 %v438_v1, %v82_v22  ;;  %s457_s15 = sld [smem:[#allocation2 + $0x282]]  ;;  %v86_v26 = vstv %s446_s0  ;;  %320 = vtanh.f32 %v65_v25 }
  0x2f   :  { %v90_v27 = vstv %s274_s10  ;;  %s280_s16 = sld [smem:[#allocation2 + $0x300]]  ;;  %v76_v28 = vadd.f32 %v75_v20, %v73_v19 }
  0x30   :  { %v84_v29 = vadd.f32 %v83_v24, %v80_v21  ;;  %v91_v30 = vmul.f32 %v90_v27, %v433_v0  ;;  %v93_v31 = vstv %s275_s11  ;;  %s281_s17 = sld [smem:[#allocation2 + $0x301]] }
  0x31   :  { %v94_v32 = vmul.f32 %v438_v1, %v93_v31  ;;  %s462_s18 = sld [smem:[#allocation2 + $0x302]]  ;;  %v97_v34 = vstv %s451_s12  ;;  %322 = vtanh.f32 %v76_v28 }
  0x32   :  { %v87_v33 = vadd.f32 %v86_v26, %v84_v29  ;;  %v101_v35 = vstv %s277_s13  ;;  %s283_s19 = sld [smem:[#allocation2 + $0x380]] }
  0x33   :  { %v95_v36 = vadd.f32 %v94_v32, %v91_v30  ;;  %v102_v37 = vmul.f32 %v101_v35, %v433_v0  ;;  %v104_v38 = vstv %s278_s14  ;;  %s284_s1 = sld [smem:[#allocation2 + $0x381]] }
  0x34   :  { %v105_v39 = vmul.f32 %v438_v1, %v104_v38  ;;  %s467_s2 = sld [smem:[#allocation2 + $0x382]]  ;;  %324 = vtanh.f32 %v87_v33  ;;  %v108_v41 = vstv %s457_s15 }
  0x35   :  { %v98_v40 = vadd.f32 %v97_v34, %v95_v36  ;;  %v112_v42 = vstv %s280_s16  ;;  %s286_s22 = sld [smem:[#allocation2 + $0x400]] }
  0x36   :  { %v106_v43 = vadd.f32 %v105_v39, %v102_v37  ;;  %v113_v44 = vmul.f32 %v112_v42, %v433_v0  ;;  %v115_v45 = vstv %s281_s17  ;;  %s287_s23 = sld [smem:[#allocation2 + $0x401]] }
  0x37   :  { %326 = vtanh.f32 %v98_v40  ;;  %v116_v46 = vmul.f32 %v438_v1, %v115_v45  ;;  %s472_s24 = sld [smem:[#allocation2 + $0x402]]  ;;  %v119_v48 = vstv %s462_s18 }
  0x38   :  { %v109_v47 = vadd.f32 %v108_v41, %v106_v43  ;;  %v123_v49 = vstv %s283_s19  ;;  %s289_s25 = sld [smem:[#allocation2 + $0x480]]  ;;  %v319_v2 = vpop.eup %318 }
  0x39   :  { %v117_v50 = vadd.f32 %v116_v46, %v113_v44  ;;  %v124_v51 = vmul.f32 %v123_v49, %v433_v0  ;;  %v126_v52 = vstv %s284_s1  ;;  %s290_s26 = sld [smem:[#allocation2 + $0x481]] }
  0x3a   :  { %328 = vtanh.f32 %v109_v47  ;;  %v127_v53 = vmul.f32 %v438_v1, %v126_v52  ;;  %s477_s27 = sld [smem:[#allocation2 + $0x482]]  ;;  %v130_v55 = vstv %s467_s2 }
  0x3b   :  { %v120_v54 = vadd.f32 %v119_v48, %v117_v50  ;;  %v134_v56 = vstv %s286_s22  ;;  %s155_s28 = sld [smem:[#allocation5]]  ;;  %v321_v6 = vpop.eup %320  ;;  %s396_s22 = smov [#allocation7]  }
  0x3c   :  { %v128_v57 = vadd.f32 %v127_v53, %v124_v51  ;;  %v135_v58 = vmul.f32 %v134_v56, %v433_v0  ;;  %v137_v59 = vstv %s287_s23  ;;  %s292_s29 = sld [smem:[#allocation5 + $0x1]]  ;;  %s249_s23 = sshll.u32 %s396_s22, 4  ;;  %s250_s23 = int_to_ptr.vmem [resolvable:$true] %s249_s23 }
  0x3d   :  { %330 = vtanh.f32 %v120_v54  ;;  %v138_v60 = vmul.f32 %v438_v1, %v137_v59  ;;  %s293_s30 = sld [smem:[#allocation5 + $0x2]]  ;;  %v141_v62 = vstv %s472_s24  ;;  %s366_s24 = scalar_lea.vmem %s250_s23, 256 }
  0x3e   :  { %v131_v61 = vadd.f32 %v130_v55, %v128_v57  ;;  %v145_v63 = vstv %s289_s25  ;;  %s294_s4 = sld [smem:[#allocation5 + $0x3]]  ;;  %v323_v8 = vpop.eup %322  ;;  %p367_p10 = scmp.ne.s32.totalorder %s250_s23, %s366_s24 }
  0x3f   :  { %v139_v3 = vadd.f32 %v138_v60, %v135_v58  ;;  %v146_v4 = vmul.f32 %v145_v63, %v433_v0  ;;  %v148_v5 = vstv %s290_s26  ;;  %s484_s5 = sld [smem:[#allocation5 + $0x4]]  ;;  %p371_p11 = scmp.lt.s32.totalorder %s250_s23, %s250_s23 }
  0x40   :  { %332 = vtanh.f32 %v131_v61  ;;  %v149_v7 = vmul.f32 %v438_v1, %v148_v5  ;;  %s487_s6 = sld [smem:[#allocation5 + $0x5]]  ;;  %v152_v10 = vstv %s477_s27  ;;  %p372_p12 = scmp.lt.s32.totalorder %s366_s24, %s366_s24 }
  0x41   :  { %v142_v9 = vadd.f32 %v141_v62, %v139_v3  ;;  %v156_v11 = vstv %s155_s28  ;;  %s490_s7 = sld [smem:[#allocation5 + $0x6]]  ;;  %v325_v12 = vpop.eup %324 }
  0x42   :  { %v150_v13 = vadd.f32 %v149_v7, %v146_v4  ;;  %v157_v14 = vmul.f32 %v319_v2, %v156_v11  ;;  %v159_v0 = vstv %s292_s29  ;;  %s492_s8 = sld [smem:[#allocation5 + $0x7]]  ;;  %p373_p13 = por %p372_p12, %p371_p11 }
  0x43   :  { %334 = vtanh.f32 %v142_v9  ;;  %v160_v15 = vmul.f32 %v321_v6, %v159_v0  ;;  %v163_v16 = vstv %s293_s30  ;;  %s494_s9 = sld [smem:[#allocation5 + $0x8]] }
  0x44   :  { %v327_v1 = vpop.eup %326  ;;  %v153_v17 = vadd.f32 %v152_v10, %v150_v13  ;;  %v164_v18 = vmul.f32 %v323_v8, %v163_v16  ;;  %v167_v19 = vstv %s294_s4  ;;  %s496_s0 = sld [smem:[#allocation5 + $0x9]]  ;;  %p374_p0 = pnand %p373_p13, %p367_p10 }
  0x45   :  { %v161_v20 = vadd.f32 %v160_v15, %v157_v14  ;;  %v168_v21 = vmul.f32 %v325_v12, %v167_v19  ;;  %v171_v22 = vstv %s484_s5  ;;  %s499_s10 = sld [smem:[#allocation5 + $0xa]] }
  0x46   :  { %336 = vtanh.f32 %v153_v17  ;;  %v175_v23 = vstv %s487_s6  ;;  %s302_s11 = sld [smem:[#allocation5 + $0x80]]  ;;  %v172_v26 = vmul.f32 %v327_v1, %v171_v22 }
  0x47   :  { %v329_v24 = vpop.eup %328  ;;  %v165_v25 = vadd.f32 %v164_v18, %v161_v20  ;;  %s303_s12 = sld [smem:[#allocation5 + $0x81]]  ;;  %v179_v27 = vstv %s490_s7 }
  0x48   :  { %s304_s13 = sld [smem:[#allocation5 + $0x82]]  ;;  %v176_v29 = vmul.f32 %v329_v24, %v175_v23  ;;  %v183_v33 = vstv %s492_s8 }
  0x49   :  { %v169_v28 = vadd.f32 %v168_v21, %v165_v25  ;;  %s305_s14 = sld [smem:[#allocation5 + $0x83]]  ;;  %v187_v40 = vstv %s494_s9 }
  0x4a   :  { %v331_v30 = vpop.eup %330  ;;  %s306_s15 = sld [smem:[#allocation5 + $0x84]]  ;;  %v191_v52 = vstv %s496_s0 }
  0x4b   :  { %v173_v31 = vadd.f32 %v172_v26, %v169_v28  ;;  %v180_v32 = vmul.f32 %v331_v30, %v179_v27  ;;  %s504_s16 = sld [smem:[#allocation5 + $0x85]]  ;;  %v195_v62 = vstv %s499_s10 }
  0x4c   :  { %v199_v34 = vstv %s302_s11  ;;  %s506_s17 = sld [smem:[#allocation5 + $0x86]] }
  0x4d   :  { %v333_v35 = vpop.eup %332  ;;  %v177_v36 = vadd.f32 %v176_v29, %v173_v31  ;;  %v200_v37 = vmul.f32 %v319_v2, %v199_v34  ;;  %v202_v38 = vstv %s303_s12  ;;  %s508_s18 = sld [smem:[#allocation5 + $0x87]] }
  0x4e   :  { %v184_v39 = vmul.f32 %v333_v35, %v183_v33  ;;  %v203_v41 = vmul.f32 %v321_v6, %v202_v38  ;;  %v206_v42 = vstv %s304_s13  ;;  %s511_s19 = sld [smem:[#allocation5 + $0x88]] }
  0x4f   :  { %v181_v43 = vadd.f32 %v180_v32, %v177_v36  ;;  %v207_v44 = vmul.f32 %v323_v8, %v206_v42  ;;  %v210_v45 = vstv %s305_s14  ;;  %s311_s1 = sld [smem:[#allocation5 + $0x89]] }
  0x50   :  { %v335_v46 = vpop.eup %334  ;;  %v204_v47 = vadd.f32 %v203_v41, %v200_v37  ;;  %v211_v48 = vmul.f32 %v325_v12, %v210_v45  ;;  %v214_v49 = vstv %s306_s15  ;;  %s312_s2 = sld [smem:[#allocation5 + $0x8a]] }
  0x51   :  { %v185_v50 = vadd.f32 %v184_v39, %v181_v43  ;;  %v188_v51 = vmul.f32 %v335_v46, %v187_v40  ;;  %v218_v53 = vstv %s504_s16  ;;  %v215_v55 = vmul.f32 %v327_v1, %v214_v49 }
  0x52   :  { %v208_v54 = vadd.f32 %v207_v44, %v204_v47  ;;  %v222_v58 = vstv %s506_s17  ;;  %v219_v61 = vmul.f32 %v329_v24, %v218_v53 }
  0x53   :  { %v337_v56 = vpop.eup %336  ;;  %v189_v57 = vadd.f32 %v188_v51, %v185_v50  ;;  %v226_v63 = vstv %s508_s18  ;;  %v223_v4 = vmul.f32 %v331_v30, %v222_v58 }
  0x54   :  { %v192_v59 = vmul.f32 %v337_v56, %v191_v52  ;;  %v212_v60 = vadd.f32 %v211_v48, %v208_v54  ;;  %v230_v5 = vstv %s511_s19  ;;  %v227_v8 = vmul.f32 %v333_v35, %v226_v63 }
  0x55   :  { %v234_v9 = vstv %s311_s1  ;;  %v231_v11 = vmul.f32 %v335_v46, %v230_v5 }
  0x56   :  { %v193_v2 = vadd.f32 %v192_v59, %v189_v57  ;;  %v216_v3 = vadd.f32 %v215_v55, %v212_v60  ;;  %v235_v13 = vmul.f32 %v337_v56, %v234_v9  ;;  %v238_v0 = vstv %s312_s2 }
  0x58   :  { %v196_v6 = vadd.f32 %v195_v62, %v193_v2  ;;  %v220_v7 = vadd.f32 %v219_v61, %v216_v3 }
  0x5a   :  { %338 = vtanh.f32 %v196_v6  ;;  %v224_v10 = vadd.f32 %v223_v4, %v220_v7 }
  0x5c   :  { %v228_v12 = vadd.f32 %v227_v8, %v224_v10 }
  0x5e   :  { %v232_v14 = vadd.f32 %v231_v11, %v228_v12 }
  0x60   :  { %v236_v15 = vadd.f32 %v235_v13, %v232_v14 }
  0x62   :  { %v239_v16 = vadd.f32 %v238_v0, %v236_v15 }
  0x64   :  { %340 = vtanh.f32 %v239_v16 }
  0x67   :  { %v339_v1 = vpop.eup %338 }
  0x68   :  { %241 = vst [vmem:[#allocation7] sm:$0xff] %v339_v1 }
  0x71   :  { %v341_v17 = vpop.eup %340 }
  0x72   :  { %243 = vst [vmem:[#allocation7 + $0x8] sm:$0xff] %v341_v17 }
  0x73   :  { %377 = shalt.err (!%p374_p0)
}
  0x74   :  { %255 = dma.vmem_to_hbm [thread:$0]  %s250_s23, 256, %s528_s3, [#allocation3], %s393_s20, %s393_s20, %s394_s21  }
  0x75   :  { %390 = dma.done.wait [#allocation3], 256  }
  0x76   :  { %391 = vsyncadd [#allocation3], 4294967040 }
  0x77   :  { %259 = vsyncpa [#allocation3], 1 }
  0x78   :  { %260 = vsyncpa [#allocation4], 1 }
  0x79   :  { %261 = vsyncpa [#allocation6], 1 }

</bundles_post_ra>
